<compile_context>
chip_gen: v7x
topology: tpu7x:2x2x1
jax: 0.10.0
libtpu: 0.0.40
codegen_flags: <defaults>
</compile_context>

<pallas_src>
import functools
import jax
import jax.numpy as jnp
from jax.experimental import pallas as pl
from jax.experimental.pallas import tpu as pltpu

_BN_EPS = 1e-5
_LANE = 128  # vreg lane width; hidden feature dims padded to a multiple of this


def _round_up(n, m):
    return ((n + m - 1) // m) * m


def _fused_mlp_kernel(*refs, n_layers, bn, bf16_mxu):
    """refs = (x, [w, packed_vec] * n_layers, out).

    packed_vec rows: 0 = bias, 1 = gamma, 2 = beta (zeros where unused).
    Hidden-layer feature dims are pre-padded to 128 with zero weight cols / zero
    bias / zero gamma / zero beta, so padded lanes stay exactly 0 through
    Linear, ReLU and BN.  The last layer is unpadded.
    """
    o_ref = refs[-1]
    x = refs[0][...].astype(jnp.float32)
    idx = 1
    for layer in range(n_layers):                      # static unroll; activations stay on-chip
        is_last = layer == n_layers - 1
        w = refs[idx][...]
        vec = refs[idx + 1][...]
        idx += 2
        b = vec[0:1, :]
        if bf16_mxu:
            y = jnp.dot(x.astype(jnp.bfloat16), w.astype(jnp.bfloat16),
                        preferred_element_type=jnp.float32)
        else:
            y = jnp.dot(x, w, preferred_element_type=jnp.float32)
        y = jnp.maximum(y + b, 0.0)                    # Linear + ReLU (f32 on the VPU)
        if bn and not is_last:
            gamma = vec[1:2, :]
            beta = vec[2:3, :]
            inv_b = jnp.float32(1.0 / y.shape[0])
            # Two-pass batch statistics (biased variance) — matches PyTorch BN fwd
            # and avoids E[y^2]-E[y]^2 cancellation.
            mean = jnp.sum(y, axis=0, keepdims=True) * inv_b
            centered = y - mean
            var = jnp.sum(centered * centered, axis=0, keepdims=True) * inv_b
            # Fold gamma / inv_std / mean into a per-feature scale+shift: one FMA over (B, N).
            scale = gamma * jax.lax.rsqrt(var + _BN_EPS)   # rsqrt -> EUP slot
            shift = beta - mean * scale
            y = y * scale + shift
        x = y
    o_ref[...] = x.astype(o_ref.dtype)


def init_mlp_params(key, ip_size, units):
    """Deterministic init mimicking nn.Linear default (U[-1/sqrt(fan_in), 1/sqrt(fan_in)]).
    Weights stored as (in_features, out_features) so the kernel does x @ W + b."""
    params = []
    u = ip_size
    for unit in units:
        key, kw, kb = jax.random.split(key, 3)
        bound = 1.0 / jnp.sqrt(jnp.float32(u))
        w = jax.random.uniform(kw, (u, unit), jnp.float32, -bound, bound)
        b = jax.random.uniform(kb, (unit,), jnp.float32, -bound, bound)
        gamma = jnp.ones((unit,), jnp.float32)   # BatchNorm1d weight
        beta = jnp.zeros((unit,), jnp.float32)   # BatchNorm1d bias
        params.append({"w": w, "b": b, "gamma": gamma, "beta": beta})
        u = unit
    return params


def prepare_packed_params(params, bn=True):
    """One-time (outside jit) parameter packing:
      * hidden-layer output (lane) dims zero-padded to a multiple of 128,
      * K dims NOT padded (first layer keeps ip_size; later layers match the
        previous padded width with zero rows),
      * last layer left unpadded (output emitted directly as (B, out_features)),
      * bias/gamma/beta stacked into one (8, N) tile per layer (rows 0/1/2)."""
    flat = []
    n_layers = len(params)
    in_p = params[0]["w"].shape[0]          # unpadded input width
    for idx, p in enumerate(params):
        is_last = idx == n_layers - 1
        k, n = p["w"].shape
        n_p = n if is_last else _round_up(n, _LANE)
        w = jnp.zeros((in_p, n_p), jnp.float32).at[:k, :n].set(p["w"])
        vec = jnp.zeros((8, n_p), jnp.float32)
        vec = vec.at[0, :n].set(p["b"])
        if bn and not is_last:
            vec = vec.at[1, :n].set(p["gamma"])
            vec = vec.at[2, :n].set(p["beta"])
        flat += [w, vec]
        in_p = n_p
    return tuple(flat)


@functools.partial(jax.jit, static_argnames=("n_layers", "bn", "bf16_mxu"))
def mlp_forward(x, flat_params, *, n_layers, bn, bf16_mxu=True):
    B = x.shape[0]
    out_features = flat_params[-2].shape[-1]           # last (unpadded) weight's N — static
    args = (x.astype(jnp.float32),) + tuple(flat_params)

    # Advisory cost estimate for the XLA scheduler.
    flops, transc = 0, 0
    for layer in range(n_layers):
        w = flat_params[2 * layer]
        flops += 2 * B * w.shape[0] * w.shape[1]
        if bn and layer != n_layers - 1:
            transc += w.shape[1]
    bytes_accessed = sum(int(a.size) * a.dtype.itemsize for a in args) + B * out_features * 4

    kernel = functools.partial(_fused_mlp_kernel, n_layers=n_layers, bn=bn, bf16_mxu=bf16_mxu)
    out = pl.pallas_call(
        kernel,
        out_shape=jax.ShapeDtypeStruct((B, out_features), jnp.float32),
        # Single block, no grid: every operand is the whole array in VMEM.
        in_specs=[pl.BlockSpec(memory_space=pltpu.MemorySpace.VMEM) for _ in args],
        out_specs=pl.BlockSpec(memory_space=pltpu.MemorySpace.VMEM),
        cost_estimate=pl.CostEstimate(flops=flops, transcendentals=transc,
                                      bytes_accessed=bytes_accessed),
    )(*args)
    return out.astype(x.dtype)


def mlp_reference(x, params, bn=True):
    """Pure-JAX reference replicating the PyTorch forward (BN in training mode)."""
    n_layers = len(params)
    for idx, p in enumerate(params):
        y = jnp.maximum(x @ p["w"] + p["b"], 0.0)
        if idx != n_layers - 1 and bn:
            mean = jnp.mean(y, axis=0, keepdims=True)
            var = jnp.mean((y - mean) ** 2, axis=0, keepdims=True)
            y = (y - mean) / jnp.sqrt(var + _BN_EPS) * p["gamma"] + p["beta"]
        x = y
    return x


if __name__ == "__main__":
    key = jax.random.PRNGKey(0)
    B, ip_size = 8, 32
    units = [64, 32, 16]

    kx, kp = jax.random.split(key)
    x = jax.random.normal(kx, (B, ip_size), jnp.float32)
    params = init_mlp_params(kp, ip_size, units)
    flat_params = prepare_packed_params(params, bn=True)   # one-time padding/packing

    ref = mlp_reference(x, params, bn=True)

    # f32 MXU operands: bit-faithful to the PyTorch module's f32 math.
    out_f32 = jax.block_until_ready(
        mlp_forward(x, flat_params, n_layers=len(units), bn=True, bf16_mxu=False))
    assert out_f32.shape == (B, units[-1]), out_f32.shape
    assert jnp.allclose(out_f32, ref, atol=1e-4, rtol=1e-4), \
        float(jnp.max(jnp.abs(out_f32 - ref)))

    # Default path: bf16 MXU operands, f32 accumulation + f32 BN epilogue.
    # Expected small precision delta vs the f32 reference (documented tradeoff).
    out_bf16 = jax.block_until_ready(
        mlp_forward(x, flat_params, n_layers=len(units), bn=True, bf16_mxu=True))
    assert out_bf16.shape == (B, units[-1]), out_bf16.shape
    assert jnp.allclose(out_bf16, ref, atol=7.5e-2, rtol=7.5e-2), \
        float(jnp.max(jnp.abs(out_bf16 - ref)))

    print("KERNEL_OK")
</pallas_src>

<mosaic_0001>
module attributes {stable_mosaic.version = 11 : i64} {
  func.func @_fused_mlp_kernel(%arg0: memref<8x32xf32, #tpu.memory_space<vmem>>, %arg1: memref<32x128xf32, #tpu.memory_space<vmem>>, %arg2: memref<8x128xf32, #tpu.memory_space<vmem>>, %arg3: memref<128x128xf32, #tpu.memory_space<vmem>>, %arg4: memref<8x128xf32, #tpu.memory_space<vmem>>, %arg5: memref<128x16xf32, #tpu.memory_space<vmem>>, %arg6: memref<8x16xf32, #tpu.memory_space<vmem>>, %arg7: memref<8x16xf32, #tpu.memory_space<vmem>>) attributes {dimension_semantics = [], scalar_prefetch = 0 : i64, scratch_operands = 0 : i64, tpu.core_type = #tpu.core_type<tc>} {
    %c0 = arith.constant 0 : index
    %c0_0 = arith.constant 0 : index
    %0 = vector.load %arg0[%c0, %c0_0] : memref<8x32xf32, #tpu.memory_space<vmem>>, vector<8x32xf32>
    %c0_1 = arith.constant 0 : index
    %c0_2 = arith.constant 0 : index
    %1 = vector.load %arg1[%c0_1, %c0_2] : memref<32x128xf32, #tpu.memory_space<vmem>>, vector<32x128xf32>
    %c0_3 = arith.constant 0 : index
    %c0_4 = arith.constant 0 : index
    %2 = vector.load %arg2[%c0_3, %c0_4] : memref<8x128xf32, #tpu.memory_space<vmem>>, vector<8x128xf32>
    %3 = vector.extract_strided_slice %2 {offsets = [0, 0], sizes = [1, 128], strides = [1, 1]} : vector<8x128xf32> to vector<1x128xf32>
    %cst = arith.constant dense<0.000000e+00> : vector<8x128xf32>
    %4 = tpu.matmul %0, %1, %cst {dimension_numbers = #tpu.dot_dimension_numbers<[1], [0], [0], [1], [0, 0, 1, 1], [], []>} : vector<8x32xf32>, vector<32x128xf32>, vector<8x128xf32> -> vector<8x128xf32>
    %5 = vector.broadcast %3 : vector<1x128xf32> to vector<8x128xf32>
    %6 = arith.addf %4, %5 : vector<8x128xf32>
    %cst_5 = arith.constant 0.000000e+00 : f32
    %7 = vector.broadcast %cst_5 : f32 to vector<8x128xf32>
    %8 = arith.maximumf %6, %7 : vector<8x128xf32>
    %9 = vector.extract_strided_slice %2 {offsets = [1, 0], sizes = [1, 128], strides = [1, 1]} : vector<8x128xf32> to vector<1x128xf32>
    %10 = vector.extract_strided_slice %2 {offsets = [2, 0], sizes = [1, 128], strides = [1, 1]} : vector<8x128xf32> to vector<1x128xf32>
    %cst_6 = arith.constant dense<0.000000e+00> : vector<128xf32>
    %11 = vector.multi_reduction <add>, %8, %cst_6 [0] : vector<8x128xf32> to vector<128xf32>
    %12 = vector.shape_cast %11 : vector<128xf32> to vector<1x128xf32>
    %cst_7 = arith.constant 1.250000e-01 : f32
    %13 = vector.broadcast %cst_7 : f32 to vector<1x128xf32>
    %14 = arith.mulf %12, %13 : vector<1x128xf32>
    %15 = vector.broadcast %14 : vector<1x128xf32> to vector<8x128xf32>
    %16 = arith.subf %8, %15 : vector<8x128xf32>
    %17 = arith.mulf %16, %16 : vector<8x128xf32>
    %cst_8 = arith.constant dense<0.000000e+00> : vector<128xf32>
    %18 = vector.multi_reduction <add>, %17, %cst_8 [0] : vector<8x128xf32> to vector<128xf32>
    %19 = vector.shape_cast %18 : vector<128xf32> to vector<1x128xf32>
    %cst_9 = arith.constant 1.250000e-01 : f32
    %20 = vector.broadcast %cst_9 : f32 to vector<1x128xf32>
    %21 = arith.mulf %19, %20 : vector<1x128xf32>
    %cst_10 = arith.constant 9.99999974E-6 : f32
    %22 = vector.broadcast %cst_10 : f32 to vector<1x128xf32>
    %23 = arith.addf %21, %22 : vector<1x128xf32>
    %24 = math.rsqrt %23 : vector<1x128xf32>
    %25 = arith.mulf %9, %24 : vector<1x128xf32>
    %26 = arith.mulf %14, %25 : vector<1x128xf32>
    %27 = arith.subf %10, %26 : vector<1x128xf32>
    %28 = vector.broadcast %25 : vector<1x128xf32> to vector<8x128xf32>
    %29 = arith.mulf %8, %28 : vector<8x128xf32>
    %30 = vector.broadcast %27 : vector<1x128xf32> to vector<8x128xf32>
    %31 = arith.addf %29, %30 : vector<8x128xf32>
    %c0_11 = arith.constant 0 : index
    %c0_12 = arith.constant 0 : index
    %32 = vector.load %arg3[%c0_11, %c0_12] : memref<128x128xf32, #tpu.memory_space<vmem>>, vector<128x128xf32>
    %c0_13 = arith.constant 0 : index
    %c0_14 = arith.constant 0 : index
    %33 = vector.load %arg4[%c0_13, %c0_14] : memref<8x128xf32, #tpu.memory_space<vmem>>, vector<8x128xf32>
    %34 = vector.extract_strided_slice %33 {offsets = [0, 0], sizes = [1, 128], strides = [1, 1]} : vector<8x128xf32> to vector<1x128xf32>
    %cst_15 = arith.constant dense<0.000000e+00> : vector<8x128xf32>
    %35 = tpu.matmul %31, %32, %cst_15 {dimension_numbers = #tpu.dot_dimension_numbers<[1], [0], [0], [1], [0, 0, 1, 1], [], []>} : vector<8x128xf32>, vector<128x128xf32>, vector<8x128xf32> -> vector<8x128xf32>
    %36 = vector.broadcast %34 : vector<1x128xf32> to vector<8x128xf32>
    %37 = arith.addf %35, %36 : vector<8x128xf32>
    %cst_16 = arith.constant 0.000000e+00 : f32
    %38 = vector.broadcast %cst_16 : f32 to vector<8x128xf32>
    %39 = arith.maximumf %37, %38 : vector<8x128xf32>
    %40 = vector.extract_strided_slice %33 {offsets = [1, 0], sizes = [1, 128], strides = [1, 1]} : vector<8x128xf32> to vector<1x128xf32>
    %41 = vector.extract_strided_slice %33 {offsets = [2, 0], sizes = [1, 128], strides = [1, 1]} : vector<8x128xf32> to vector<1x128xf32>
    %cst_17 = arith.constant dense<0.000000e+00> : vector<128xf32>
    %42 = vector.multi_reduction <add>, %39, %cst_17 [0] : vector<8x128xf32> to vector<128xf32>
    %43 = vector.shape_cast %42 : vector<128xf32> to vector<1x128xf32>
    %cst_18 = arith.constant 1.250000e-01 : f32
    %44 = vector.broadcast %cst_18 : f32 to vector<1x128xf32>
    %45 = arith.mulf %43, %44 : vector<1x128xf32>
    %46 = vector.broadcast %45 : vector<1x128xf32> to vector<8x128xf32>
    %47 = arith.subf %39, %46 : vector<8x128xf32>
    %48 = arith.mulf %47, %47 : vector<8x128xf32>
    %cst_19 = arith.constant dense<0.000000e+00> : vector<128xf32>
    %49 = vector.multi_reduction <add>, %48, %cst_19 [0] : vector<8x128xf32> to vector<128xf32>
    %50 = vector.shape_cast %49 : vector<128xf32> to vector<1x128xf32>
    %cst_20 = arith.constant 1.250000e-01 : f32
    %51 = vector.broadcast %cst_20 : f32 to vector<1x128xf32>
    %52 = arith.mulf %50, %51 : vector<1x128xf32>
    %cst_21 = arith.constant 9.99999974E-6 : f32
    %53 = vector.broadcast %cst_21 : f32 to vector<1x128xf32>
    %54 = arith.addf %52, %53 : vector<1x128xf32>
    %55 = math.rsqrt %54 : vector<1x128xf32>
    %56 = arith.mulf %40, %55 : vector<1x128xf32>
    %57 = arith.mulf %45, %56 : vector<1x128xf32>
    %58 = arith.subf %41, %57 : vector<1x128xf32>
    %59 = vector.broadcast %56 : vector<1x128xf32> to vector<8x128xf32>
    %60 = arith.mulf %39, %59 : vector<8x128xf32>
    %61 = vector.broadcast %58 : vector<1x128xf32> to vector<8x128xf32>
    %62 = arith.addf %60, %61 : vector<8x128xf32>
    %c0_22 = arith.constant 0 : index
    %c0_23 = arith.constant 0 : index
    %63 = vector.load %arg5[%c0_22, %c0_23] : memref<128x16xf32, #tpu.memory_space<vmem>>, vector<128x16xf32>
    %c0_24 = arith.constant 0 : index
    %c0_25 = arith.constant 0 : index
    %64 = vector.load %arg6[%c0_24, %c0_25] : memref<8x16xf32, #tpu.memory_space<vmem>>, vector<8x16xf32>
    %65 = vector.extract_strided_slice %64 {offsets = [0, 0], sizes = [1, 16], strides = [1, 1]} : vector<8x16xf32> to vector<1x16xf32>
    %cst_26 = arith.constant dense<0.000000e+00> : vector<8x16xf32>
    %66 = tpu.matmul %62, %63, %cst_26 {dimension_numbers = #tpu.dot_dimension_numbers<[1], [0], [0], [1], [0, 0, 1, 1], [], []>} : vector<8x128xf32>, vector<128x16xf32>, vector<8x16xf32> -> vector<8x16xf32>
    %67 = vector.broadcast %65 : vector<1x16xf32> to vector<8x16xf32>
    %68 = arith.addf %66, %67 : vector<8x16xf32>
    %cst_27 = arith.constant 0.000000e+00 : f32
    %69 = vector.broadcast %cst_27 : f32 to vector<8x16xf32>
    %70 = arith.maximumf %68, %69 : vector<8x16xf32>
    %c0_28 = arith.constant 0 : index
    %c0_29 = arith.constant 0 : index
    %71 = vector.load %arg7[%c0_28, %c0_29] : memref<8x16xf32, #tpu.memory_space<vmem>>, vector<8x16xf32>
    tpu.vector_store %arg7[%c0_28, %c0_29], %70 {strides = array<i32>} : memref<8x16xf32, #tpu.memory_space<vmem>>, vector<8x16xf32>,
    return
  }
}

</mosaic_0001>

<bundles_post_ra>
// kernel: mlp_forward.1
= control target key start
LH: loop header
LB: loop body
LE: loop exit
PB: predicated region body
PF: predicated region fallthrough
CT: control target
= control target key end

     0   :  { %12 = vsyncpa [#allocation3], 0  ;;  %s946_s0 = inlined_call_operand.vmem [shape: f32[8,32], index: 0, kind: input, shape index: {}]   ;;  %s947_s1 = inlined_call_operand.hbm [shape: f32[32,128], index: 1, kind: input, shape index: {}]   ;;  %s948_s2 = inlined_call_operand.vmem [shape: f32[8,128], index: 2, kind: input, shape index: {}]   ;;  %s949_s3 = inlined_call_operand.vmem [shape: f32[128,128], index: 3, kind: input, shape index: {}]   ;;  %s950_s4 = inlined_call_operand.hbm [shape: f32[8,128], index: 4, kind: input, shape index: {}]   ;;  %s951_s5 = inlined_call_operand.vmem [shape: f32[128,16], index: 5, kind: input, shape index: {}]   ;;  %s952_s6 = inlined_call_operand.hbm [shape: f32[8,16], index: 6, kind: input, shape index: {}]   ;;  %s953_s7 = inlined_call_operand.hbm [shape: f32[8,16], index: 7, kind: output, shape index: {}]  }
   0x1   :  { %13 = vsyncpa [#allocation6], 0 }
   0x2   :  { %14 = vsyncpa [#allocation4], 0  ;;  %s701_s24 = smov [#allocation5]   ;;  %s702_s26 = smov [#allocation2]  }
   0x3   :  { %s39_s25 = sshll.u32 %s701_s24, 4  ;;  %s22_s27 = sshll.u32 %s702_s26, 4  ;;  %s40_s25 = int_to_ptr.vmem [resolvable:$true] %s39_s25  ;;  %s750_s27 = int_to_ptr.vmem [resolvable:$true] %s22_s27 }
   0x4   :  { %s607_s30 = scalar_lea.hbm %s950_s4, 128 }
   0x5   :  { %p608_p0 = scmp.ne.s32.totalorder %s950_s4, %s607_s30  ;;  %p611_p1 = scmp.lt.u32.totalorder %s607_s30, %s950_s4 }
   0x7   :  { %p613_p2 = pnand %p611_p1, %p608_p0 }
   0x9   :  { %616 = shalt.err (!%p613_p2)
}
   0xa   :  { %s617_s12 = scalar_lea.vmem %s40_s25, 128  ;;  %p622_p4 = scmp.lt.s32.totalorder %s40_s25, %s40_s25 }
   0xb   :  { %p618_p3 = scmp.ne.s32.totalorder %s40_s25, %s617_s12  ;;  %p623_p5 = scmp.lt.s32.totalorder %s617_s12, %s617_s12 }
   0xd   :  { %p624_p6 = por %p623_p5, %p622_p4 }
   0xf   :  { %p625_p7 = pnand %p624_p6, %p618_p3 }
  0x11   :  { %628 = shalt.err (!%p625_p7)
}
  0x12   :  { %42 = dma.hbm_to_vmem [thread:$0]  %s950_s4, 128, %s40_s25, [#allocation6]  }
  0x13   :  { %s629_s17 = scalar_lea.hbm %s947_s1, 512 }
  0x14   :  { %p630_p8 = scmp.ne.s32.totalorder %s947_s1, %s629_s17  ;;  %p633_p9 = scmp.lt.u32.totalorder %s629_s17, %s947_s1 }
  0x16   :  { %p635_p10 = pnand %p633_p9, %p630_p8 }
  0x18   :  { %638 = shalt.err (!%p635_p10)
}
  0x19   :  { %s639_s22 = scalar_lea.vmem %s750_s27, 512  ;;  %p644_p12 = scmp.lt.s32.totalorder %s750_s27, %s750_s27 }
  0x1a   :  { %p640_p11 = scmp.ne.s32.totalorder %s750_s27, %s639_s22  ;;  %p645_p13 = scmp.lt.s32.totalorder %s639_s22, %s639_s22 }
  0x1c   :  { %p646_p0 = por %p645_p13, %p644_p12 }
  0x1e   :  { %p647_p1 = pnand %p646_p0, %p640_p11 }
  0x20   :  { %650 = shalt.err (!%p647_p1)
}
  0x21   :  { %s703_s4 = smov 128   ;;  %s704_s23 = smov 8  }
  0x22   :  { %28 = dma.hbm_to_vmem [thread:$0]  %s947_s1, 512, %s750_s27, [#allocation3], %s703_s4, %s703_s4, %s704_s23  }
  0x23   :  { %s705_s26 = smov [#allocation7]   ;;  %s651_s8 = scalar_lea.hbm %s952_s6, 128 }
  0x24   :  { %s51_s28 = sshll.u32 %s705_s26, 4  ;;  %p652_p2 = scmp.ne.s32.totalorder %s952_s6, %s651_s8  ;;  %s52_s28 = int_to_ptr.vmem [resolvable:$true] %s51_s28 }
  0x25   :  { %p655_p3 = scmp.lt.u32.totalorder %s651_s8, %s952_s6 }
  0x27   :  { %p657_p4 = pnand %p655_p3, %p652_p2 }
  0x29   :  { %660 = shalt.err (!%p657_p4)
}
  0x2a   :  { %s661_s13 = scalar_lea.vmem %s52_s28, 128  ;;  %p666_p6 = scmp.lt.s32.totalorder %s52_s28, %s52_s28 }
  0x2b   :  { %p662_p5 = scmp.ne.s32.totalorder %s52_s28, %s661_s13  ;;  %p667_p7 = scmp.lt.s32.totalorder %s661_s13, %s661_s13 }
  0x2d   :  { %p668_p8 = por %p667_p7, %p666_p6 }
  0x2f   :  { %p669_p9 = pnand %p668_p8, %p662_p5 }
  0x31   :  { %672 = shalt.err (!%p669_p9)
}
  0x32   :  { %54 = dma.hbm_to_vmem [thread:$0]  %s952_s6, 128, %s52_s28, [#allocation6]  }
  0x33   :  { %695 = dma.done.wait [#allocation3], 512  }
  0x34   :  { %696 = vsyncadd [#allocation3], 4294966784 }
  0x35   :  { %697 = dma.done.wait [#allocation6], 256  }
  0x36   :  { %698 = vsyncadd [#allocation6], 4294967040  ;;  %v706_v0 = vmov 0.0|0.0   ;;  %vm707_vm0 = vmmov 0   ;;  %v708_v1 = vmov 0.0   ;;  %v65_v2 = vld [vmem:[#allocation2] sm:$0xff]  ;;  %v70_v33 = vlaneseq }
  0x37   :  { %540 = vmatprep.subr.bf16.mxu0 %v706_v0  ;;  %467 = vmatprep.mubr.msk.f32.mxu0 %vm707_vm0, %v708_v1  ;;  %v66_v3 = vld [vmem:[#allocation2 + $0x8] sm:$0xff]  ;;  %v67_v4 = vld [vmem:[#allocation2 + $0x10] sm:$0xff]  ;;  %v68_v6 = vld [vmem:[#allocation2 + $0x18] sm:$0xff]  ;;  %vm74_vm1 = vcmask 261120   ;;  %vm401_vm2 = vcmask 130048  }
  0x38   :  { %546 = vmatprep.subr.bf16.mxu1 %v706_v0  ;;  %502 = vmatprep.mubr.msk.f32.mxu1 %vm707_vm0, %v708_v1  ;;  %v541_v5 = vpack.c.bf16 %v66_v3, %v65_v2  ;;  %v544_v7 = vpack.c.bf16 %v68_v6, %v67_v4  ;;  %v64_v8 = vld [vmem:[%s946_s0] sm:$0xff]  ;;  %v184_v10 = vld [vmem:[%s949_s3 + $0x8] sm:$0xff]  ;;  %v185_v12 = vld [vmem:[%s949_s3 + $0x10] sm:$0xff]  ;;  %v858_v34 = vshrl.u32 %v70_v33, 7 }
  0x39   :  { %v183_v9 = vld [vmem:[%s949_s3] sm:$0xff]  ;;  %v186_v13 = vld [vmem:[%s949_s3 + $0x18] sm:$0xff]  ;;  %v188_v16 = vld [vmem:[%s949_s3 + $0x28] sm:$0xff] }
  0x3a   :  { %542 = vmatpush3.bf16.msra.mxu0 %v541_v5  ;;  %v547_v11 = vpack.c.bf16 %v184_v10, %v183_v9  ;;  %v550_v14 = vpack.c.bf16 %v186_v13, %v185_v12  ;;  %v187_v15 = vld [vmem:[%s949_s3 + $0x20] sm:$0xff]  ;;  %v189_v18 = vld [vmem:[%s949_s3 + $0x30] sm:$0xff]  ;;  %v190_v19 = vld [vmem:[%s949_s3 + $0x38] sm:$0xff]  ;;  %v861_v35 = vsub.s32 0, %v858_v34  ;;  %v175_v61 = vsub.s32 1, %v858_v34 }
  0x3b   :  { %543 = vmatprep.subr.bf16.mxu0 %v706_v0  ;;  %v553_v17 = vpack.c.bf16 %v188_v16, %v187_v15  ;;  %v556_v20 = vpack.c.bf16 %v190_v19, %v189_v18  ;;  %v191_v21 = vld [vmem:[%s949_s3 + $0x40] sm:$0xff]  ;;  %v192_v22 = vld [vmem:[%s949_s3 + $0x48] sm:$0xff]  ;;  %v193_v24 = vld [vmem:[%s949_s3 + $0x50] sm:$0xff]  ;;  %v180_v2 = vsub.s32 2, %v858_v34 }
  0x3c   :  { %548 = vmatpush3.bf16.msra.mxu1 %v547_v11  ;;  %v559_v23 = vpack.c.bf16 %v192_v22, %v191_v21  ;;  %v194_v25 = vld [vmem:[%s949_s3 + $0x58] sm:$0xff]  ;;  %v195_v27 = vld [vmem:[%s949_s3 + $0x60] sm:$0xff]  ;;  %v196_v28 = vld [vmem:[%s949_s3 + $0x68] sm:$0xff] }
  0x3d   :  { %549 = vmatprep.subr.bf16.mxu1 %v706_v0  ;;  %v562_v26 = vpack.c.bf16 %v194_v25, %v193_v24  ;;  %v565_v29 = vpack.c.bf16 %v196_v28, %v195_v27  ;;  %v197_v30 = vld [vmem:[%s949_s3 + $0x70] sm:$0xff]  ;;  %v198_v31 = vld [vmem:[%s949_s3 + $0x78] sm:$0xff]  ;;  %v69_v36 = vld [vmem:[%s948_s2] sm:$0xff] }
  0x3e   :  { %545 = vmatpush3.bf16.msra.mxu0 %v544_v7  ;;  %v568_v32 = vpack.c.bf16 %v198_v31, %v197_v30  ;;  %v73_v37 = vrot.slane %v69_v36, %v861_v35  ;;  %v309_v7 = vld [vmem:[%s951_s5] sm:$0xff]  ;;  %v311_v10 = vld [vmem:[%s951_s5 + $0x10] sm:$0xff]  ;;  %v312_v11 = vld [vmem:[%s951_s5 + $0x18] sm:$0xff] }
  0x3f   :  { %570 = vmatprep.subr.bf16.mxu0 %v706_v0  ;;  %v574_v12 = vpack.c.bf16 %v312_v11, %v311_v10  ;;  %v313_v13 = vld [vmem:[%s951_s5 + $0x20] sm:$0xff]  ;;  %v315_v16 = vld [vmem:[%s951_s5 + $0x30] sm:$0xff] }
  0x40   :  { %551 = vmatpush3.bf16.msra.mxu1 %v550_v14  ;;  %v314_v14 = vld [vmem:[%s951_s5 + $0x28] sm:$0xff]  ;;  %v317_v19 = vld [vmem:[%s951_s5 + $0x40] sm:$0xff]  ;;  %v319_v22 = vld [vmem:[%s951_s5 + $0x50] sm:$0xff] }
  0x41   :  { %468 = vmatmul.mubr.msk.f32.vlgmr.msra.gmra.mrb[0].mxu0 %vm74_vm1, %v64_v8  ;;  %552 = vmatprep.subr.bf16.mxu1 %v706_v0  ;;  %v310_v8 = vld [vmem:[%s951_s5 + $0x8] sm:$0xff]  ;;  %v577_v15 = vpack.c.bf16 %v314_v14, %v313_v13  ;;  %v321_v25 = vld [vmem:[%s951_s5 + $0x60] sm:$0xff]  ;;  %v323_v28 = vld [vmem:[%s951_s5 + $0x70] sm:$0xff] }
  0x42   :  { %537 = vmatprep.mubr.msk.f32.mxu0 %vm707_vm0, %v708_v1  ;;  %v571_v9 = vpack.c.bf16 %v310_v8, %v309_v7  ;;  %v199_v31 = vld [vmem:[#allocation5] sm:$0xff] }
  0x44   :  { %554 = vmatpush3.bf16.msra.mxu1 %v553_v17  ;;  %572 = vmatpush3.bf16.msra.mxu0 %v571_v9  ;;  %v316_v17 = vld [vmem:[%s951_s5 + $0x38] sm:$0xff] }
  0x45   :  { %555 = vmatprep.subr.bf16.mxu1 %v706_v0  ;;  %573 = vmatprep.subr.bf16.mxu0 %v706_v0  ;;  %v580_v18 = vpack.c.bf16 %v316_v17, %v315_v16 }
  0x48   :  { %557 = vmatpush3.bf16.msra.mxu1 %v556_v20  ;;  %575 = vmatpush3.bf16.msra.mxu0 %v574_v12  ;;  %v318_v20 = vld [vmem:[%s951_s5 + $0x48] sm:$0xff] }
  0x49   :  { %558 = vmatprep.subr.bf16.mxu1 %v706_v0  ;;  %576 = vmatprep.subr.bf16.mxu0 %v706_v0  ;;  %v583_v21 = vpack.c.bf16 %v318_v20, %v317_v19 }
  0x4c   :  { %560 = vmatpush3.bf16.msra.mxu1 %v559_v23  ;;  %578 = vmatpush3.bf16.msra.mxu0 %v577_v15  ;;  %v320_v23 = vld [vmem:[%s951_s5 + $0x58] sm:$0xff] }
  0x4d   :  { %561 = vmatprep.subr.bf16.mxu1 %v706_v0  ;;  %579 = vmatprep.subr.bf16.mxu0 %v706_v0  ;;  %v586_v24 = vpack.c.bf16 %v320_v23, %v319_v22 }
  0x50   :  { %563 = vmatpush3.bf16.msra.mxu1 %v562_v26  ;;  %581 = vmatpush3.bf16.msra.mxu0 %v580_v18  ;;  %v322_v26 = vld [vmem:[%s951_s5 + $0x68] sm:$0xff] }
  0x51   :  { %564 = vmatprep.subr.bf16.mxu1 %v706_v0  ;;  %582 = vmatprep.subr.bf16.mxu0 %v706_v0  ;;  %v589_v27 = vpack.c.bf16 %v322_v26, %v321_v25 }
  0x54   :  { %566 = vmatpush3.bf16.msra.mxu1 %v565_v29  ;;  %584 = vmatpush3.bf16.msra.mxu0 %v583_v21  ;;  %v324_v29 = vld [vmem:[%s951_s5 + $0x78] sm:$0xff]  ;;  %s709_s5 = smov [#allocation8]  }
  0x55   :  { %567 = vmatprep.subr.bf16.mxu1 %v706_v0  ;;  %585 = vmatprep.subr.bf16.mxu0 %v706_v0  ;;  %v592_v30 = vpack.c.bf16 %v324_v29, %v323_v28  ;;  %s409_s22 = sshll.u32 %s709_s5, 4  ;;  %s410_s22 = int_to_ptr.vmem [resolvable:$true] %s409_s22 }
  0x56   :  { %s673_s4 = scalar_lea.vmem %s410_s22, 128  ;;  %p678_p11 = scmp.lt.s32.totalorder %s410_s22, %s410_s22 }
  0x57   :  { %p674_p10 = scmp.ne.s32.totalorder %s410_s22, %s673_s4  ;;  %p679_p12 = scmp.lt.s32.totalorder %s673_s4, %s673_s4 }
  0x58   :  { %569 = vmatpush3.bf16.msra.mxu1 %v568_v32  ;;  %587 = vmatpush3.bf16.msra.mxu0 %v586_v24  ;;  %v203_v32 = vrot.slane %v199_v31, %v861_v35 }
  0x59   :  { %588 = vmatprep.subr.bf16.mxu0 %v706_v0  ;;  %p680_p13 = por %p679_p12, %p678_p11 }
  0x5b   :  { %p681_p0 = pnand %p680_p13, %p674_p10 }
  0x5c   :  { %590 = vmatpush3.bf16.msra.mxu0 %v589_v27 }
  0x5d   :  { %591 = vmatprep.subr.bf16.mxu0 %v706_v0 }
  0x60   :  { %593 = vmatpush3.bf16.msra.mxu0 %v592_v30 }
 0x114   :  { %v144_v38 = vpop.f32.mrb[0].mxu0 }
 0x115   :  { %v145_v39 = vadd.f32 %v144_v38, %v73_v37  ;;  %v469_v40 = vpop.f32.mrb[1].mxu0 }
 0x117   :  { %v148_v41 = vmax.f32 %v145_v39, 0.0 }
 0x119   :  { %v149_v42 = vrot.slane %v148_v41, 4 }
 0x11b   :  { %v150_v43 = vadd.f32 %v149_v42, %v148_v41 }
 0x11d   :  { %v151_v44 = vrot.slane %v150_v43, 2 }
 0x11f   :  { %v152_v45 = vadd.f32 %v151_v44, %v150_v43 }
 0x121   :  { %v153_v46 = vrot.slane %v152_v45, 1 }
 0x123   :  { %v154_v47 = vadd.f32 %v153_v46, %v152_v45 }
 0x125   :  { %v155_v48 = vmul.f32 0.125, %v154_v47 }
 0x127   :  { %v156_v49 = vsub.f32 %v148_v41, %v155_v48 }
 0x129   :  { %v157_v50 = vmul.f32 %v156_v49, %v156_v49 }
 0x12b   :  { %v158_v51 = vrot.slane %v157_v50, 4 }
 0x12d   :  { %v159_v52 = vadd.f32 %v158_v51, %v157_v50 }
 0x12f   :  { %v160_v53 = vrot.slane %v159_v52, 2 }
 0x131   :  { %v161_v54 = vadd.f32 %v160_v53, %v159_v52 }
 0x133   :  { %v162_v55 = vrot.slane %v161_v54, 1 }
 0x135   :  { %v163_v56 = vadd.f32 %v162_v55, %v161_v54 }
 0x137   :  { %v164_v57 = vmul.f32 0.125, %v163_v56 }
 0x139   :  { %v165_v58 = vadd.f32 1e-05, %v164_v57 }
 0x13b   :  { %603 = vrsqrt.f32 %v165_v58 }
 0x145   :  { %v604_v59 = vpop.eup %603 }
 0x146   :  { %v167_v60 = vmul.f32 %v604_v59, %v69_v36 }
 0x148   :  { %v168_v62 = vmul.f32 %v167_v60, %v155_v48  ;;  %v176_v1 = vrot.slane %v167_v60, %v175_v61 }
 0x14a   :  { %v170_v63 = vrot.slane %v168_v62, 7  ;;  %v177_v4 = vmul.f32 %v176_v1, %v148_v41 }
 0x14c   :  { %v172_v3 = vsub.f32 %v69_v36, %v170_v63 }
 0x14e   :  { %v181_v5 = vrot.slane %v172_v3, %v180_v2  ;;  %v325_v3 = vld [vmem:[#allocation7] sm:$0xff] }
 0x150   :  { %v182_v6 = vadd.f32 %v181_v5, %v177_v4  ;;  %v329_v4 = vrot.slane %v325_v3, %v861_v35 }
 0x152   :  { %503 = vmatmul.mubr.f32.vlgmr.msra.gmra.mrb[0].mxu1 %v182_v6 }
 0x225   :  { %v270_v33 = vpop.f32.mrb[0].mxu1 }
 0x226   :  { %v271_v36 = vadd.f32 %v270_v33, %v203_v32  ;;  %v504_v37 = vpop.f32.mrb[1].mxu1 }
 0x228   :  { %v274_v38 = vmax.f32 %v271_v36, 0.0 }
 0x22a   :  { %v275_v39 = vrot.slane %v274_v38, 4 }
 0x22c   :  { %v276_v40 = vadd.f32 %v275_v39, %v274_v38 }
 0x22e   :  { %v277_v0 = vrot.slane %v276_v40, 2 }
 0x230   :  { %v278_v41 = vadd.f32 %v277_v0, %v276_v40 }
 0x232   :  { %v279_v42 = vrot.slane %v278_v41, 1 }
 0x234   :  { %v280_v43 = vadd.f32 %v279_v42, %v278_v41 }
 0x236   :  { %v281_v44 = vmul.f32 0.125, %v280_v43 }
 0x238   :  { %v282_v45 = vsub.f32 %v274_v38, %v281_v44 }
 0x23a   :  { %v283_v46 = vmul.f32 %v282_v45, %v282_v45 }
 0x23c   :  { %v284_v47 = vrot.slane %v283_v46, 4 }
 0x23e   :  { %v285_v48 = vadd.f32 %v284_v47, %v283_v46 }
 0x240   :  { %v286_v49 = vrot.slane %v285_v48, 2 }
 0x242   :  { %v287_v50 = vadd.f32 %v286_v49, %v285_v48 }
 0x244   :  { %v288_v51 = vrot.slane %v287_v50, 1 }
 0x246   :  { %v289_v52 = vadd.f32 %v288_v51, %v287_v50 }
 0x248   :  { %v290_v53 = vmul.f32 0.125, %v289_v52 }
 0x24a   :  { %v291_v54 = vadd.f32 1e-05, %v290_v53 }
 0x24c   :  { %605 = vrsqrt.f32 %v291_v54 }
 0x256   :  { %v606_v55 = vpop.eup %605 }
 0x257   :  { %v293_v56 = vmul.f32 %v606_v55, %v199_v31 }
 0x259   :  { %v294_v57 = vmul.f32 %v293_v56, %v281_v44  ;;  %v302_v59 = vrot.slane %v293_v56, %v175_v61 }
 0x25b   :  { %v296_v58 = vrot.slane %v294_v57, 7  ;;  %v303_v62 = vmul.f32 %v302_v59, %v274_v38 }
 0x25d   :  { %v298_v60 = vsub.f32 %v199_v31, %v296_v58 }
 0x25f   :  { %v307_v63 = vrot.slane %v298_v60, %v180_v2 }
 0x261   :  { %v308_v1 = vadd.f32 %v307_v63, %v303_v62 }
 0x263   :  { %538 = vmatmul.mubr.f32.vlgmr.msra.gmra.mrb[2].mxu0 %v308_v1 }
 0x336   :  { %v396_v5 = vpop.f32.mrb[2].mxu0 }
 0x337   :  { %v397_v6 = vadd.f32 %v396_v5, %v329_v4  ;;  %v539_v7 = vpop.f32.mrb[3].mxu0 }
 0x339   :  { %v400_v8 = vmax.f32 %v397_v6, 0.0 }
 0x33b   :  { %402 = vst.msk [vmem:[#allocation8] sm:$0xff] %vm401_vm2, %v400_v8 }
 0x33c   :  { %684 = shalt.err (!%p681_p0)
}
 0x33d   :  { %s685_s25 = scalar_lea.hbm %s953_s7, 128 }
 0x33e   :  { %p686_p1 = scmp.ne.s32.totalorder %s953_s7, %s685_s25  ;;  %p689_p2 = scmp.lt.u32.totalorder %s685_s25, %s953_s7 }
 0x340   :  { %p691_p3 = pnand %p689_p2, %p686_p1 }
 0x342   :  { %694 = shalt.err (!%p691_p3)
}
 0x343   :  { %412 = dma.vmem_to_hbm [thread:$0]  %s410_s22, 128, %s953_s7, [#allocation4]  }
 0x344   :  { %699 = dma.done.wait [#allocation4], 128  }
 0x345   :  { %700 = vsyncadd [#allocation4], 4294967168 }
 0x346   :  { %416 = vsyncpa [#allocation3], 1 }
 0x347   :  { %417 = vsyncpa [#allocation6], 1 }
 0x348   :  { %418 = vsyncpa [#allocation4], 1 }

</bundles_post_ra>
